<compile_context>
chip_gen: v6e
topology: v6e:2x2x1
jax: 0.10.0
libtpu: 0.0.40
codegen_flags: <defaults>
</compile_context>

<pallas_src>
import numpy as np
import jax
import jax.numpy as jnp
from jax.experimental import pallas as pl
from jax.experimental.pallas import tpu as pltpu

# Fixed instantiation of the module:
#   input_size(vocab)=25, embed_size=16, numeric_feature_dim=4, hidden_dim=32,
#   n_layers=1, bidirectional=False, dropout=0.0 (inference -> identity),
#   concat_after=False, rnn_type='LSTM'
VOCAB = 25
VOCAB_PAD = 32          # sublane-friendly padding of the folded embedding table
EMBED = 16
NFD = 4
HIDDEN = 32


# ----------------------------- Pallas kernel --------------------------------

def fused_lstm_head_kernel(seq_ref, props_ref, g_ref, wp_t_ref, whh_t_ref, b_ref,
                           wlin_ref, blin_ref, score_ref):
    """Whole forward in one invocation: embedding fold + LSTM recurrence + head.

    seq_ref   : (T*B, 1)  int32 token ids (time-major flattened)
    props_ref : (T*B, F)  numeric features
    g_ref     : (VP, 4H)  folded embedding->gates table (row v = emb[v] @ W_ih_e^T)
    wp_t_ref  : (F, 4H)   features->gates weight, transposed
    whh_t_ref : (H, 4H)   hidden->gates weight, transposed (PyTorch i,f,g,o order)
    b_ref     : (1, 4H)   b_ih + b_hh
    wlin_ref  : (1, H)    head weight
    blin_ref  : (1,)      head bias (SMEM scalar)
    score_ref : (T, B)    sigmoid(linear(h_t)) for every (t, b); single store
    """
    T, B = score_ref.shape
    H = whh_t_ref.shape[0]
    TB = seq_ref.shape[0]
    vocab_pad = g_ref.shape[0]

    # Embedding lookup as a one-hot MXU matmul against the folded table, plus the
    # numeric-feature contribution and the hoisted bias: x-side gate pre-activations
    # for ALL timesteps, computed off the serial recurrence chain.
    onehot = (seq_ref[...] ==
              jax.lax.broadcasted_iota(jnp.int32, (TB, vocab_pad), 1)
              ).astype(jnp.float32)                                    # (T*B, VP)
    xw = (jnp.dot(onehot, g_ref[...], preferred_element_type=jnp.float32)
          + jnp.dot(props_ref[...], wp_t_ref[...],
                    preferred_element_type=jnp.float32)
          + b_ref[...])                                                # (T*B, 4H)

    whh_t = whh_t_ref[...]                                             # (H, 4H)

    hs = []
    h = c = None
    for t in range(T):   # T static & tiny: full unroll, concrete aligned slices
        if t == 0:
            gates = xw[0:B, :]                                         # h0 = 0
        else:
            gates = xw[t * B:(t + 1) * B, :] + jnp.dot(
                h, whh_t, preferred_element_type=jnp.float32)          # (B, 4H)
        # Activations on the full 4H-lane vreg (EUP slot), then static lane slices.
        sg = jax.nn.sigmoid(gates)
        tg = jnp.tanh(gates)
        i_g = sg[:, 0 * H:1 * H]
        f_g = sg[:, 1 * H:2 * H]
        g_g = tg[:, 2 * H:3 * H]
        o_g = sg[:, 3 * H:4 * H]
        c = i_g * g_g if t == 0 else f_g * c + i_g * g_g               # c0 = 0
        h = o_g * jnp.tanh(c)
        hs.append(h)                                                   # stays in vregs

    # Fused head: a 1-output-column matmul would waste the MXU, so use a VPU
    # broadcast-multiply + lane reduce over the vreg-resident hidden states.
    hs = jnp.stack(hs, axis=0)                                         # (T, B, H)
    logits = jnp.sum(hs * wlin_ref[...], axis=-1) + blin_ref[0]        # (T, B)
    score_ref[...] = jax.nn.sigmoid(logits)


# --------------------------- parameter preparation ---------------------------

def prepare_params(params):
    """One-time (load-time) fold / transpose of weights into kernel-ready layout.

    Kept OUT of the per-call path: each of these would otherwise be a separate
    XLA fusion costing as much as the whole ~1 us kernel.
    """
    w_ih = params["w_ih"]                                              # (4H, E+F)
    g = jnp.dot(params["embedding"], w_ih[:, :EMBED].T,
                precision=jax.lax.Precision.HIGHEST)                   # (VOCAB, 4H)
    g_pad = jnp.zeros((VOCAB_PAD, 4 * HIDDEN), jnp.float32).at[:VOCAB].set(g)
    return {
        "g_table": g_pad,                                              # (VP, 4H)
        "wp_t": w_ih[:, EMBED:].T,                                     # (F, 4H)
        "whh_t": params["w_hh"].T,                                     # (H, 4H)
        "b": (params["b_ih"] + params["b_hh"])[None, :],               # (1, 4H)
        "wlin": params["w_lin"].reshape(1, HIDDEN),                    # (1, H)
        "blin": params["b_lin"].reshape(1),                            # (1,)
    }


# ------------------------------ per-call path ---------------------------------

@jax.jit
def epitope_scores(prepped, sequences_tb, properties_tbf):
    """Per-position scores (T, B) via one fused, gridless Pallas kernel."""
    T, B = sequences_tb.shape
    seq = sequences_tb.reshape(T * B, 1).astype(jnp.int32)
    props = properties_tbf.reshape(T * B, NFD).astype(jnp.float32)
    vmem = pl.BlockSpec(memory_space=pltpu.MemorySpace.VMEM)
    smem = pl.BlockSpec(memory_space=pltpu.MemorySpace.SMEM)
    return pl.pallas_call(
        fused_lstm_head_kernel,
        out_shape=jax.ShapeDtypeStruct((T, B), jnp.float32),
        in_specs=[vmem, vmem, vmem, vmem, vmem, vmem, vmem, smem],
        out_specs=vmem,
    )(seq, props, prepped["g_table"], prepped["wp_t"], prepped["whh_t"],
      prepped["b"], prepped["wlin"], prepped["blin"])


def packed_indices(lengths, T):
    """Row order of torch pack_padded_sequence(..., enforce_sorted=False).data."""
    order = np.argsort(-np.asarray(lengths), kind="stable")
    t_idx, b_idx = [], []
    for t in range(T):
        for b in order:
            if lengths[b] > t:
                t_idx.append(t)
                b_idx.append(int(b))
    return np.array(t_idx), np.array(b_idx)


def epitope_predictor_forward(prepped, sequences_tb, properties_tbf, text_lengths):
    # sequences_tb: (T, B) int32; properties_tbf: (T, B, NFD) f32; text_lengths: np (B,)
    T, B = sequences_tb.shape
    scores = np.asarray(epitope_scores(prepped, sequences_tb, properties_tbf))  # (T, B)
    # pack_padded_sequence row ordering + gather, host-side NumPy (needs concrete
    # lengths; output length is data-dependent, so keep it out of jit).
    # TODO(synk): dropout is stochastic at train time; implemented as identity (eval).
    # TODO(synk): bidirectional / multi-layer / GRU / concat_after variants not implemented.
    t_idx, b_idx = packed_indices(text_lengths, T)
    return scores[t_idx, b_idx].reshape(-1, 1)


# ------------------------------- reference ------------------------------------

def reference_forward(params, sequences_tb, properties_tbf, text_lengths):
    """Pure-JAX reference (lax.scan LSTM) for correctness checking."""
    T, B = sequences_tb.shape
    emb = jnp.take(params["embedding"], sequences_tb, axis=0)
    x = jnp.concatenate([emb, properties_tbf], axis=-1)

    def step(carry, x_t):
        h, c = carry
        gates = (x_t @ params["w_ih"].T + params["b_ih"]
                 + h @ params["w_hh"].T + params["b_hh"])
        i, f, g, o = jnp.split(gates, 4, axis=-1)
        c = jax.nn.sigmoid(f) * c + jax.nn.sigmoid(i) * jnp.tanh(g)
        h = jax.nn.sigmoid(o) * jnp.tanh(c)
        return (h, c), h

    init = (jnp.zeros((B, HIDDEN), jnp.float32), jnp.zeros((B, HIDDEN), jnp.float32))
    _, hs = jax.lax.scan(step, init, x)
    t_idx, b_idx = packed_indices(text_lengths, T)
    packed = hs[t_idx, b_idx, :]
    return jax.nn.sigmoid(packed @ params["w_lin"].T + params["b_lin"])


# ------------------------------- main -----------------------------------------

if __name__ == "__main__":
    key = jax.random.PRNGKey(0)
    ks = jax.random.split(key, 9)
    params = {
        "embedding": jax.random.normal(ks[0], (VOCAB, EMBED), jnp.float32) * 0.1,
        "w_ih": jax.random.normal(ks[1], (4 * HIDDEN, EMBED + NFD), jnp.float32) * 0.1,
        "w_hh": jax.random.normal(ks[2], (4 * HIDDEN, HIDDEN), jnp.float32) * 0.1,
        "b_ih": jax.random.normal(ks[3], (4 * HIDDEN,), jnp.float32) * 0.1,
        "b_hh": jax.random.normal(ks[4], (4 * HIDDEN,), jnp.float32) * 0.1,
        "w_lin": jax.random.normal(ks[5], (1, HIDDEN), jnp.float32) * 0.1,
        "b_lin": jax.random.normal(ks[6], (1,), jnp.float32) * 0.1,
    }
    prepped = jax.block_until_ready(prepare_params(params))   # one-time, load-time

    T, B = 8, 8
    sequences = jax.random.randint(ks[7], (T, B), 0, VOCAB, dtype=jnp.int32)
    properties = jax.random.normal(ks[8], (T, B, NFD), jnp.float32)
    text_lengths = np.array([8, 6, 8, 5, 3, 8, 7, 4], dtype=np.int32)

    out = jax.block_until_ready(
        epitope_predictor_forward(prepped, sequences, properties, text_lengths))
    ref = jax.block_until_ready(
        reference_forward(params, sequences, properties, text_lengths))

    assert out.shape == (int(text_lengths.sum()), 1)
    np.testing.assert_allclose(np.asarray(out), np.asarray(ref), rtol=1e-5, atol=1e-5)
    print("KERNEL_OK")
</pallas_src>

<mosaic_0001>
module attributes {stable_mosaic.version = 11 : i64} {
  func.func @fused_lstm_head_kernel(%arg0: memref<64x1xi32, #tpu.memory_space<vmem>>, %arg1: memref<64x4xf32, #tpu.memory_space<vmem>>, %arg2: memref<32x128xf32, #tpu.memory_space<vmem>>, %arg3: memref<4x128xf32, #tpu.memory_space<vmem>>, %arg4: memref<32x128xf32, #tpu.memory_space<vmem>>, %arg5: memref<1x128xf32, #tpu.memory_space<vmem>>, %arg6: memref<1x32xf32, #tpu.memory_space<vmem>>, %arg7: memref<1xf32, #tpu.memory_space<smem>>, %arg8: memref<8x8xf32, #tpu.memory_space<vmem>>) attributes {dimension_semantics = [], scalar_prefetch = 0 : i64, scratch_operands = 0 : i64, tpu.core_type = #tpu.core_type<tc>} {
    %c0 = arith.constant 0 : index
    %c0_0 = arith.constant 0 : index
    %0 = vector.load %arg0[%c0, %c0_0] : memref<64x1xi32, #tpu.memory_space<vmem>>, vector<64x1xi32>
    %1 = tpu.iota {dimensions = array<i32: 1>} : vector<64x32xi32>
    %2 = vector.broadcast %0 : vector<64x1xi32> to vector<64x32xi32>
    %3 = arith.cmpi eq, %2, %1 : vector<64x32xi32>
    %4 = arith.extui %3 : vector<64x32xi1> to vector<64x32xi32>
    %5 = arith.sitofp %4 : vector<64x32xi32> to vector<64x32xf32>
    %c0_1 = arith.constant 0 : index
    %c0_2 = arith.constant 0 : index
    %6 = vector.load %arg2[%c0_1, %c0_2] : memref<32x128xf32, #tpu.memory_space<vmem>>, vector<32x128xf32>
    %cst = arith.constant dense<0.000000e+00> : vector<64x128xf32>
    %7 = tpu.matmul %5, %6, %cst {dimension_numbers = #tpu.dot_dimension_numbers<[1], [0], [0], [1], [0, 0, 1, 1], [], []>} : vector<64x32xf32>, vector<32x128xf32>, vector<64x128xf32> -> vector<64x128xf32>
    %c0_3 = arith.constant 0 : index
    %c0_4 = arith.constant 0 : index
    %8 = vector.load %arg1[%c0_3, %c0_4] : memref<64x4xf32, #tpu.memory_space<vmem>>, vector<64x4xf32>
    %c0_5 = arith.constant 0 : index
    %c0_6 = arith.constant 0 : index
    %9 = vector.load %arg3[%c0_5, %c0_6] : memref<4x128xf32, #tpu.memory_space<vmem>>, vector<4x128xf32>
    %cst_7 = arith.constant dense<0.000000e+00> : vector<64x128xf32>
    %10 = tpu.matmul %8, %9, %cst_7 {dimension_numbers = #tpu.dot_dimension_numbers<[1], [0], [0], [1], [0, 0, 1, 1], [], []>} : vector<64x4xf32>, vector<4x128xf32>, vector<64x128xf32> -> vector<64x128xf32>
    %11 = arith.addf %7, %10 : vector<64x128xf32>
    %c0_8 = arith.constant 0 : index
    %c0_9 = arith.constant 0 : index
    %12 = vector.load %arg5[%c0_8, %c0_9] : memref<1x128xf32, #tpu.memory_space<vmem>>, vector<1x128xf32>
    %13 = vector.broadcast %12 : vector<1x128xf32> to vector<64x128xf32>
    %14 = arith.addf %11, %13 : vector<64x128xf32>
    %c0_10 = arith.constant 0 : index
    %c0_11 = arith.constant 0 : index
    %15 = vector.load %arg4[%c0_10, %c0_11] : memref<32x128xf32, #tpu.memory_space<vmem>>, vector<32x128xf32>
    %16 = vector.extract_strided_slice %14 {offsets = [0, 0], sizes = [8, 128], strides = [1, 1]} : vector<64x128xf32> to vector<8x128xf32>
    %17 = arith.negf %16 : vector<8x128xf32>
    %18 = math.exp %17 : vector<8x128xf32>
    %cst_12 = arith.constant 1.000000e+00 : f32
    %19 = vector.broadcast %cst_12 : f32 to vector<8x128xf32>
    %20 = arith.addf %19, %18 : vector<8x128xf32>
    %21 = arith.divf %19, %20 : vector<8x128xf32>
    %22 = math.tanh %16 : vector<8x128xf32>
    %23 = vector.extract_strided_slice %21 {offsets = [0, 0], sizes = [8, 32], strides = [1, 1]} : vector<8x128xf32> to vector<8x32xf32>
    %24 = vector.extract_strided_slice %22 {offsets = [0, 64], sizes = [8, 32], strides = [1, 1]} : vector<8x128xf32> to vector<8x32xf32>
    %25 = vector.extract_strided_slice %21 {offsets = [0, 96], sizes = [8, 32], strides = [1, 1]} : vector<8x128xf32> to vector<8x32xf32>
    %26 = arith.mulf %23, %24 : vector<8x32xf32>
    %27 = math.tanh %26 : vector<8x32xf32>
    %28 = arith.mulf %25, %27 : vector<8x32xf32>
    %29 = vector.extract_strided_slice %14 {offsets = [8, 0], sizes = [8, 128], strides = [1, 1]} : vector<64x128xf32> to vector<8x128xf32>
    %cst_13 = arith.constant dense<0.000000e+00> : vector<8x128xf32>
    %30 = tpu.matmul %28, %15, %cst_13 {dimension_numbers = #tpu.dot_dimension_numbers<[1], [0], [0], [1], [0, 0, 1, 1], [], []>} : vector<8x32xf32>, vector<32x128xf32>, vector<8x128xf32> -> vector<8x128xf32>
    %31 = arith.addf %29, %30 : vector<8x128xf32>
    %32 = arith.negf %31 : vector<8x128xf32>
    %33 = math.exp %32 : vector<8x128xf32>
    %cst_14 = arith.constant 1.000000e+00 : f32
    %34 = vector.broadcast %cst_14 : f32 to vector<8x128xf32>
    %35 = arith.addf %34, %33 : vector<8x128xf32>
    %36 = arith.divf %34, %35 : vector<8x128xf32>
    %37 = math.tanh %31 : vector<8x128xf32>
    %38 = vector.extract_strided_slice %36 {offsets = [0, 0], sizes = [8, 32], strides = [1, 1]} : vector<8x128xf32> to vector<8x32xf32>
    %39 = vector.extract_strided_slice %36 {offsets = [0, 32], sizes = [8, 32], strides = [1, 1]} : vector<8x128xf32> to vector<8x32xf32>
    %40 = vector.extract_strided_slice %37 {offsets = [0, 64], sizes = [8, 32], strides = [1, 1]} : vector<8x128xf32> to vector<8x32xf32>
    %41 = vector.extract_strided_slice %36 {offsets = [0, 96], sizes = [8, 32], strides = [1, 1]} : vector<8x128xf32> to vector<8x32xf32>
    %42 = arith.mulf %39, %26 : vector<8x32xf32>
    %43 = arith.mulf %38, %40 : vector<8x32xf32>
    %44 = arith.addf %42, %43 : vector<8x32xf32>
    %45 = math.tanh %44 : vector<8x32xf32>
    %46 = arith.mulf %41, %45 : vector<8x32xf32>
    %47 = vector.extract_strided_slice %14 {offsets = [16, 0], sizes = [8, 128], strides = [1, 1]} : vector<64x128xf32> to vector<8x128xf32>
    %cst_15 = arith.constant dense<0.000000e+00> : vector<8x128xf32>
    %48 = tpu.matmul %46, %15, %cst_15 {dimension_numbers = #tpu.dot_dimension_numbers<[1], [0], [0], [1], [0, 0, 1, 1], [], []>} : vector<8x32xf32>, vector<32x128xf32>, vector<8x128xf32> -> vector<8x128xf32>
    %49 = arith.addf %47, %48 : vector<8x128xf32>
    %50 = arith.negf %49 : vector<8x128xf32>
    %51 = math.exp %50 : vector<8x128xf32>
    %cst_16 = arith.constant 1.000000e+00 : f32
    %52 = vector.broadcast %cst_16 : f32 to vector<8x128xf32>
    %53 = arith.addf %52, %51 : vector<8x128xf32>
    %54 = arith.divf %52, %53 : vector<8x128xf32>
    %55 = math.tanh %49 : vector<8x128xf32>
    %56 = vector.extract_strided_slice %54 {offsets = [0, 0], sizes = [8, 32], strides = [1, 1]} : vector<8x128xf32> to vector<8x32xf32>
    %57 = vector.extract_strided_slice %54 {offsets = [0, 32], sizes = [8, 32], strides = [1, 1]} : vector<8x128xf32> to vector<8x32xf32>
    %58 = vector.extract_strided_slice %55 {offsets = [0, 64], sizes = [8, 32], strides = [1, 1]} : vector<8x128xf32> to vector<8x32xf32>
    %59 = vector.extract_strided_slice %54 {offsets = [0, 96], sizes = [8, 32], strides = [1, 1]} : vector<8x128xf32> to vector<8x32xf32>
    %60 = arith.mulf %57, %44 : vector<8x32xf32>
    %61 = arith.mulf %56, %58 : vector<8x32xf32>
    %62 = arith.addf %60, %61 : vector<8x32xf32>
    %63 = math.tanh %62 : vector<8x32xf32>
    %64 = arith.mulf %59, %63 : vector<8x32xf32>
    %65 = vector.extract_strided_slice %14 {offsets = [24, 0], sizes = [8, 128], strides = [1, 1]} : vector<64x128xf32> to vector<8x128xf32>
    %cst_17 = arith.constant dense<0.000000e+00> : vector<8x128xf32>
    %66 = tpu.matmul %64, %15, %cst_17 {dimension_numbers = #tpu.dot_dimension_numbers<[1], [0], [0], [1], [0, 0, 1, 1], [], []>} : vector<8x32xf32>, vector<32x128xf32>, vector<8x128xf32> -> vector<8x128xf32>
    %67 = arith.addf %65, %66 : vector<8x128xf32>
    %68 = arith.negf %67 : vector<8x128xf32>
    %69 = math.exp %68 : vector<8x128xf32>
    %cst_18 = arith.constant 1.000000e+00 : f32
    %70 = vector.broadcast %cst_18 : f32 to vector<8x128xf32>
    %71 = arith.addf %70, %69 : vector<8x128xf32>
    %72 = arith.divf %70, %71 : vector<8x128xf32>
    %73 = math.tanh %67 : vector<8x128xf32>
    %74 = vector.extract_strided_slice %72 {offsets = [0, 0], sizes = [8, 32], strides = [1, 1]} : vector<8x128xf32> to vector<8x32xf32>
    %75 = vector.extract_strided_slice %72 {offsets = [0, 32], sizes = [8, 32], strides = [1, 1]} : vector<8x128xf32> to vector<8x32xf32>
    %76 = vector.extract_strided_slice %73 {offsets = [0, 64], sizes = [8, 32], strides = [1, 1]} : vector<8x128xf32> to vector<8x32xf32>
    %77 = vector.extract_strided_slice %72 {offsets = [0, 96], sizes = [8, 32], strides = [1, 1]} : vector<8x128xf32> to vector<8x32xf32>
    %78 = arith.mulf %75, %62 : vector<8x32xf32>
    %79 = arith.mulf %74, %76 : vector<8x32xf32>
    %80 = arith.addf %78, %79 : vector<8x32xf32>
    %81 = math.tanh %80 : vector<8x32xf32>
    %82 = arith.mulf %77, %81 : vector<8x32xf32>
    %83 = vector.extract_strided_slice %14 {offsets = [32, 0], sizes = [8, 128], strides = [1, 1]} : vector<64x128xf32> to vector<8x128xf32>
    %cst_19 = arith.constant dense<0.000000e+00> : vector<8x128xf32>
    %84 = tpu.matmul %82, %15, %cst_19 {dimension_numbers = #tpu.dot_dimension_numbers<[1], [0], [0], [1], [0, 0, 1, 1], [], []>} : vector<8x32xf32>, vector<32x128xf32>, vector<8x128xf32> -> vector<8x128xf32>
    %85 = arith.addf %83, %84 : vector<8x128xf32>
    %86 = arith.negf %85 : vector<8x128xf32>
    %87 = math.exp %86 : vector<8x128xf32>
    %cst_20 = arith.constant 1.000000e+00 : f32
    %88 = vector.broadcast %cst_20 : f32 to vector<8x128xf32>
    %89 = arith.addf %88, %87 : vector<8x128xf32>
    %90 = arith.divf %88, %89 : vector<8x128xf32>
    %91 = math.tanh %85 : vector<8x128xf32>
    %92 = vector.extract_strided_slice %90 {offsets = [0, 0], sizes = [8, 32], strides = [1, 1]} : vector<8x128xf32> to vector<8x32xf32>
    %93 = vector.extract_strided_slice %90 {offsets = [0, 32], sizes = [8, 32], strides = [1, 1]} : vector<8x128xf32> to vector<8x32xf32>
    %94 = vector.extract_strided_slice %91 {offsets = [0, 64], sizes = [8, 32], strides = [1, 1]} : vector<8x128xf32> to vector<8x32xf32>
    %95 = vector.extract_strided_slice %90 {offsets = [0, 96], sizes = [8, 32], strides = [1, 1]} : vector<8x128xf32> to vector<8x32xf32>
    %96 = arith.mulf %93, %80 : vector<8x32xf32>
    %97 = arith.mulf %92, %94 : vector<8x32xf32>
    %98 = arith.addf %96, %97 : vector<8x32xf32>
    %99 = math.tanh %98 : vector<8x32xf32>
    %100 = arith.mulf %95, %99 : vector<8x32xf32>
    %101 = vector.extract_strided_slice %14 {offsets = [40, 0], sizes = [8, 128], strides = [1, 1]} : vector<64x128xf32> to vector<8x128xf32>
    %cst_21 = arith.constant dense<0.000000e+00> : vector<8x128xf32>
    %102 = tpu.matmul %100, %15, %cst_21 {dimension_numbers = #tpu.dot_dimension_numbers<[1], [0], [0], [1], [0, 0, 1, 1], [], []>} : vector<8x32xf32>, vector<32x128xf32>, vector<8x128xf32> -> vector<8x128xf32>
    %103 = arith.addf %101, %102 : vector<8x128xf32>
    %104 = arith.negf %103 : vector<8x128xf32>
    %105 = math.exp %104 : vector<8x128xf32>
    %cst_22 = arith.constant 1.000000e+00 : f32
    %106 = vector.broadcast %cst_22 : f32 to vector<8x128xf32>
    %107 = arith.addf %106, %105 : vector<8x128xf32>
    %108 = arith.divf %106, %107 : vector<8x128xf32>
    %109 = math.tanh %103 : vector<8x128xf32>
    %110 = vector.extract_strided_slice %108 {offsets = [0, 0], sizes = [8, 32], strides = [1, 1]} : vector<8x128xf32> to vector<8x32xf32>
    %111 = vector.extract_strided_slice %108 {offsets = [0, 32], sizes = [8, 32], strides = [1, 1]} : vector<8x128xf32> to vector<8x32xf32>
    %112 = vector.extract_strided_slice %109 {offsets = [0, 64], sizes = [8, 32], strides = [1, 1]} : vector<8x128xf32> to vector<8x32xf32>
    %113 = vector.extract_strided_slice %108 {offsets = [0, 96], sizes = [8, 32], strides = [1, 1]} : vector<8x128xf32> to vector<8x32xf32>
    %114 = arith.mulf %111, %98 : vector<8x32xf32>
    %115 = arith.mulf %110, %112 : vector<8x32xf32>
    %116 = arith.addf %114, %115 : vector<8x32xf32>
    %117 = math.tanh %116 : vector<8x32xf32>
    %118 = arith.mulf %113, %117 : vector<8x32xf32>
    %119 = vector.extract_strided_slice %14 {offsets = [48, 0], sizes = [8, 128], strides = [1, 1]} : vector<64x128xf32> to vector<8x128xf32>
    %cst_23 = arith.constant dense<0.000000e+00> : vector<8x128xf32>
    %120 = tpu.matmul %118, %15, %cst_23 {dimension_numbers = #tpu.dot_dimension_numbers<[1], [0], [0], [1], [0, 0, 1, 1], [], []>} : vector<8x32xf32>, vector<32x128xf32>, vector<8x128xf32> -> vector<8x128xf32>
    %121 = arith.addf %119, %120 : vector<8x128xf32>
    %122 = arith.negf %121 : vector<8x128xf32>
    %123 = math.exp %122 : vector<8x128xf32>
    %cst_24 = arith.constant 1.000000e+00 : f32
    %124 = vector.broadcast %cst_24 : f32 to vector<8x128xf32>
    %125 = arith.addf %124, %123 : vector<8x128xf32>
    %126 = arith.divf %124, %125 : vector<8x128xf32>
    %127 = math.tanh %121 : vector<8x128xf32>
    %128 = vector.extract_strided_slice %126 {offsets = [0, 0], sizes = [8, 32], strides = [1, 1]} : vector<8x128xf32> to vector<8x32xf32>
    %129 = vector.extract_strided_slice %126 {offsets = [0, 32], sizes = [8, 32], strides = [1, 1]} : vector<8x128xf32> to vector<8x32xf32>
    %130 = vector.extract_strided_slice %127 {offsets = [0, 64], sizes = [8, 32], strides = [1, 1]} : vector<8x128xf32> to vector<8x32xf32>
    %131 = vector.extract_strided_slice %126 {offsets = [0, 96], sizes = [8, 32], strides = [1, 1]} : vector<8x128xf32> to vector<8x32xf32>
    %132 = arith.mulf %129, %116 : vector<8x32xf32>
    %133 = arith.mulf %128, %130 : vector<8x32xf32>
    %134 = arith.addf %132, %133 : vector<8x32xf32>
    %135 = math.tanh %134 : vector<8x32xf32>
    %136 = arith.mulf %131, %135 : vector<8x32xf32>
    %137 = vector.extract_strided_slice %14 {offsets = [56, 0], sizes = [8, 128], strides = [1, 1]} : vector<64x128xf32> to vector<8x128xf32>
    %cst_25 = arith.constant dense<0.000000e+00> : vector<8x128xf32>
    %138 = tpu.matmul %136, %15, %cst_25 {dimension_numbers = #tpu.dot_dimension_numbers<[1], [0], [0], [1], [0, 0, 1, 1], [], []>} : vector<8x32xf32>, vector<32x128xf32>, vector<8x128xf32> -> vector<8x128xf32>
    %139 = arith.addf %137, %138 : vector<8x128xf32>
    %140 = arith.negf %139 : vector<8x128xf32>
    %141 = math.exp %140 : vector<8x128xf32>
    %cst_26 = arith.constant 1.000000e+00 : f32
    %142 = vector.broadcast %cst_26 : f32 to vector<8x128xf32>
    %143 = arith.addf %142, %141 : vector<8x128xf32>
    %144 = arith.divf %142, %143 : vector<8x128xf32>
    %145 = math.tanh %139 : vector<8x128xf32>
    %146 = vector.extract_strided_slice %144 {offsets = [0, 0], sizes = [8, 32], strides = [1, 1]} : vector<8x128xf32> to vector<8x32xf32>
    %147 = vector.extract_strided_slice %144 {offsets = [0, 32], sizes = [8, 32], strides = [1, 1]} : vector<8x128xf32> to vector<8x32xf32>
    %148 = vector.extract_strided_slice %145 {offsets = [0, 64], sizes = [8, 32], strides = [1, 1]} : vector<8x128xf32> to vector<8x32xf32>
    %149 = vector.extract_strided_slice %144 {offsets = [0, 96], sizes = [8, 32], strides = [1, 1]} : vector<8x128xf32> to vector<8x32xf32>
    %150 = arith.mulf %147, %134 : vector<8x32xf32>
    %151 = arith.mulf %146, %148 : vector<8x32xf32>
    %152 = arith.addf %150, %151 : vector<8x32xf32>
    %153 = math.tanh %152 : vector<8x32xf32>
    %154 = arith.mulf %149, %153 : vector<8x32xf32>
    %155 = vector.shape_cast %28 : vector<8x32xf32> to vector<1x8x32xf32>
    %156 = vector.shape_cast %46 : vector<8x32xf32> to vector<1x8x32xf32>
    %157 = vector.shape_cast %64 : vector<8x32xf32> to vector<1x8x32xf32>
    %158 = vector.shape_cast %82 : vector<8x32xf32> to vector<1x8x32xf32>
    %159 = vector.shape_cast %100 : vector<8x32xf32> to vector<1x8x32xf32>
    %160 = vector.shape_cast %118 : vector<8x32xf32> to vector<1x8x32xf32>
    %161 = vector.shape_cast %136 : vector<8x32xf32> to vector<1x8x32xf32>
    %162 = vector.shape_cast %154 : vector<8x32xf32> to vector<1x8x32xf32>
    %163 = tpu.concatenate %155, %156, %157, %158, %159, %160, %161, %162 in 0 : vector<1x8x32xf32>, vector<1x8x32xf32>, vector<1x8x32xf32>, vector<1x8x32xf32>, vector<1x8x32xf32>, vector<1x8x32xf32>, vector<1x8x32xf32>, vector<1x8x32xf32> -> vector<8x8x32xf32>
    %c0_27 = arith.constant 0 : index
    %c0_28 = arith.constant 0 : index
    %164 = vector.load %arg6[%c0_27, %c0_28] : memref<1x32xf32, #tpu.memory_space<vmem>>, vector<1x32xf32>
    %165 = vector.shape_cast %164 : vector<1x32xf32> to vector<1x1x32xf32>
    %166 = vector.broadcast %165 : vector<1x1x32xf32> to vector<8x8x32xf32>
    %167 = arith.mulf %163, %166 : vector<8x8x32xf32>
    %cst_29 = arith.constant dense<0.000000e+00> : vector<8x8xf32>
    %168 = vector.multi_reduction <add>, %167, %cst_29 [2] : vector<8x8x32xf32> to vector<8x8xf32>
    %c0_30 = arith.constant 0 : index
    %169 = memref.load %arg7[%c0_30] : memref<1xf32, #tpu.memory_space<smem>>
    %170 = vector.broadcast %169 : f32 to vector<8x8xf32>
    %171 = arith.addf %168, %170 : vector<8x8xf32>
    %172 = arith.negf %171 : vector<8x8xf32>
    %173 = math.exp %172 : vector<8x8xf32>
    %cst_31 = arith.constant 1.000000e+00 : f32
    %174 = vector.broadcast %cst_31 : f32 to vector<8x8xf32>
    %175 = arith.addf %174, %173 : vector<8x8xf32>
    %176 = arith.divf %174, %175 : vector<8x8xf32>
    %c0_32 = arith.constant 0 : index
    %c0_33 = arith.constant 0 : index
    %177 = vector.load %arg8[%c0_32, %c0_33] : memref<8x8xf32, #tpu.memory_space<vmem>>, vector<8x8xf32>
    tpu.vector_store %arg8[%c0_32, %c0_33], %176 {strides = array<i32>} : memref<8x8xf32, #tpu.memory_space<vmem>>, vector<8x8xf32>,
    return
  }
}

</mosaic_0001>

<bundles_post_ra>
// kernel: epitope_scores.1
= control target key start
LH: loop header
LB: loop body
LE: loop exit
PB: predicated region body
PF: predicated region fallthrough
CT: control target
= control target key end

     0   :  { %vm127_vm0 = vcmask 1043456   ;;  %v1653_v2 = vmov 0   ;;  %vm102_vm1 = vcmask 31744   ;;  %s2038_s0 = inlined_call_operand.vmem [shape: s32[64,1], index: 0, kind: input, shape index: {}]   ;;  %s2039_s1 = inlined_call_operand.vmem [shape: f32[64,4], index: 1, kind: input, shape index: {}]   ;;  %s2040_s2 = inlined_call_operand.vmem [shape: f32[32,128], index: 2, kind: input, shape index: {}]   ;;  %s2041_s3 = inlined_call_operand.vmem [shape: f32[4,128], index: 3, kind: input, shape index: {}]   ;;  %s2042_s4 = inlined_call_operand.vmem [shape: f32[32,128], index: 4, kind: input, shape index: {}]   ;;  %s2043_s5 = inlined_call_operand.vmem [shape: f32[1,128], index: 5, kind: input, shape index: {}]   ;;  %s2044_s6 = inlined_call_operand.vmem [shape: f32[1,32], index: 6, kind: input, shape index: {}]   ;;  %s2045_s7 = inlined_call_operand.<no memory space> [shape: f32[1], index: 7, kind: input, shape index: {}]   ;;  %s2046_s8 = inlined_call_operand.hbm [shape: f32[8,8], index: 8, kind: output, shape index: {}]  }
   0x1   :  { %v31_v0 = vld [vmem:[%s2038_s0] sm:$0xff]  ;;  %v92_v1 = vld [vmem:[%s2040_s2 + $0x18] sm:$0xff]  ;;  %1533 = vset.pattern.permute.xlu0 %v1653_v2  ;;  %v91_v3 = vld [vmem:[%s2040_s2 + $0x10] sm:$0xff] }
   0x2   :  { %1429 = vmatprep.subr.mxu1 %v92_v1  ;;  %v101_v4 = vld [vmem:[%s2041_s3] sm:$0xf]  ;;  %42 = vperm.xlu0 %1533, %v31_v0   ;;  %v90_v5 = vld [vmem:[%s2040_s2 + $0x8] sm:$0xff] }
   0x3   :  { %1430 = vmatpush3.msra.mxu1 %v92_v1  ;;  %v93_v6 = vld [vmem:[%s2039_s1] sm:$0xff]  ;;  %v32_v7 = vld [vmem:[%s2038_s0 + $0x8] sm:$0xff]  ;;  %1415 = vmatprep.subr.msk.mxu0 %vm127_vm0, %v101_v4 }
   0x4   :  { %1431 = vmatprep.subr.mxu1 %v91_v3 }
   0x5   :  { %14 = vsyncpa [#allocation4], 0  ;;  %1432 = vmatpush3.msra.mxu1 %v91_v3  ;;  %1416 = vmatpush3.msk.msra.mxu0 %vm127_vm0, %v101_v4  ;;  %v94_v8 = vld [vmem:[%s2039_s1 + $0x8] sm:$0xff]  ;;  %v89_v9 = vld [vmem:[%s2040_s2] sm:$0xff]  ;;  %v1654_v10 = vmov 0.0   ;;  %v39_v11 = vlaneseq  ;;  %vm236_vm2 = vcmask 261120  }
   0x6   :  { %1433 = vmatprep.subr.mxu1 %v90_v5  ;;  %1417 = vmatprep.mubr.msk.f32.mxu0 %vm102_vm1, %v93_v6  ;;  %v1754_v22 = vld [vmem:[%s2043_s5] ss:$0 sm:$0xff]  ;;  %s1655_s23 = smov 64   ;;  %v1761_v31 = vld [vmem:[%s2042_s4 + $0x18] sm:$0xff]  ;;  %v95_v32 = vld [vmem:[%s2039_s1 + $0x10] sm:$0xff]  ;;  %s1656_s3 = smov 96  }
   0x7   :  { %45 = vperm.xlu0 %1533, %v32_v7   ;;  %1434 = vmatpush3.msra.mxu1 %v90_v5  ;;  %v1739_v12 = vand.u32 127, %v39_v11  ;;  %v96_v33 = vld [vmem:[%s2039_s1 + $0x18] sm:$0xff]  ;;  %v1774_v34 = vld [vmem:[%s2042_s4 + $0x10] sm:$0xff]  ;;  %v97_v35 = vld [vmem:[%s2039_s1 + $0x20] sm:$0xff]  ;;  %vm1657_vm5 = vmmov 0   ;;  %vm1278_vm12 = vcmask 1041409  }
   0x8   :  { %1418 = vmatmul.mubr.msk.f32.vlgmr.msra.gmra.mxu0 %vm102_vm1, %v94_v8  ;;  %1435 = vmatprep.subr.mxu1 %v89_v9  ;;  %v1784_v36 = vld [vmem:[%s2042_s4 + $0x8] sm:$0xff]  ;;  %v99_v38 = vld [vmem:[%s2039_s1 + $0x30] sm:$0xff]  ;;  %v1800_v39 = vld [vmem:[%s2042_s4] sm:$0xff]  ;;  %vm1280_vm13 = vcmask 1042434   ;;  %vm1282_vm14 = vcmask 1043459   ;;  %vm1284_vm15 = vcmask 1044484  }
   0x9   :  { %1436 = vmatpush3.msra.mxu1 %v89_v9  ;;  %1449 = vmatprep.subr.mxu0 %v1654_v10  ;;  %v98_v37 = vld [vmem:[%s2039_s1 + $0x28] sm:$0xff]  ;;  %v100_v41 = vld [vmem:[%s2039_s1 + $0x38] sm:$0xff]  ;;  %s1658_s1 = smov 32   ;;  %v33_v63 = vld [vmem:[%s2038_s0 + $0x10] sm:$0xff]  ;;  %vm1286_vm0 = vcmask 1045509  }
   0xa   :  { %1534 = vset.pattern.permute.xlu1 %v1653_v2  ;;  %1460 = vmatprep.subr.mxu1 %v1654_v10  ;;  %v35_v0 = vld [vmem:[%s2038_s0 + $0x20] sm:$0xff]  ;;  %v37_v1 = vld [vmem:[%s2038_s0 + $0x30] sm:$0xff]  ;;  %v34_v9 = vld [vmem:[%s2038_s0 + $0x18] sm:$0xff] }
   0xb   :  { %1450 = vmatpush3.msra.mxu0 %v1761_v31  ;;  %1420 = vmatprep.mubr.msk.f32.mxu0 %vm102_vm1, %v95_v32 }
   0xc   :  { %1421 = vmatmul.mubr.msk.f32.gmra.mxu0 %vm102_vm1, %v96_v33  ;;  %1451 = vmatprep.subr.mxu0 %v1654_v10 }
   0xd   :  { %1452 = vmatpush3.msra.mxu0 %v1774_v34  ;;  %1423 = vmatprep.mubr.msk.f32.mxu0 %vm102_vm1, %v97_v35 }
   0xe   :  { %1453 = vmatprep.subr.mxu0 %v1654_v10 }
   0xf   :  { %1454 = vmatpush3.msra.mxu0 %v1784_v36 }
  0x10   :  { %1424 = vmatmul.mubr.msk.f32.gmra.mxu0 %vm102_vm1, %v98_v37  ;;  %1455 = vmatprep.subr.mxu0 %v1654_v10 }
  0x11   :  { %1426 = vmatprep.mubr.msk.f32.mxu0 %vm102_vm1, %v99_v38  ;;  %1456 = vmatpush3.msra.mxu0 %v1800_v39 }
  0x12   :  { %1471 = vmatprep.subr.mxu0 %v1654_v10 }
  0x14   :  { %1427 = vmatmul.mubr.msk.f32.gmra.mxu0 %vm102_vm1, %v100_v41  ;;  %vm1288_vm1 = vcmask 1046534  }
  0x15   :  { %1457 = vmatprep.mubr.msk.f32.mxu0 %vm1657_vm5, %v1654_v10 }
  0x7d   :  { %v43_v13 = vpop.permute.xlu0 %42 }
  0x7e   :  { %vm65_vm3 = vcmp.eq.s32.totalorder %v43_v13, %v1739_v12  ;;  %v36_v13 = vld [vmem:[%s2038_s0 + $0x28] sm:$0xff] }
  0x7f   :  { %v1309_v14 = vsel %vm65_vm3, 1.0, %v1654_v10  ;;  %vm1293_vm3 = vcmask 64512  }
  0x80   :  { %1437 = vmatprep.mubr.msk.f32.mxu1 %vm236_vm2, %v1309_v14  ;;  %v38_v14 = vld [vmem:[%s2038_s0 + $0x38] sm:$0xff] }
  0x82   :  { %v46_v15 = vpop.permute.xlu0 %45 }
  0x83   :  { %vm66_vm4 = vcmp.eq.s32.totalorder %v46_v15, %v1739_v12 }
  0x84   :  { %v1310_v16 = vsel %vm66_vm4, 1.0, %v1654_v10 }
  0x85   :  { %1438 = vmatmul.mubr.msk.f32.vlgmr.msra.gmra.mxu1 %vm236_vm2, %v1310_v16 }
  0x86   :  { %1461 = vmatpush3.msra.mxu1 %v1761_v31 }
  0x87   :  { %1462 = vmatprep.subr.mxu1 %v1654_v10 }
  0x88   :  { %1463 = vmatpush3.msra.mxu1 %v1774_v34 }
  0x89   :  { %1464 = vmatprep.subr.mxu1 %v1654_v10 }
  0x8a   :  { %1465 = vmatpush3.msra.mxu1 %v1784_v36 }
  0x8b   :  { %1466 = vmatprep.subr.mxu1 %v1654_v10 }
  0x8c   :  { %1467 = vmatpush3.msra.mxu1 %v1800_v39 }
  0x8d   :  { %1482 = vmatprep.subr.mxu1 %v1654_v10 }
  0xc8   :  { %v1747_v17 = vpop.f32.mrf.mxu0 }
  0xca   :  { %v197_v19 = vpop.f32.mrf.mxu0 }
  0xcc   :  { %v1837_v45 = vpop.f32.mrf.mxu0 }
  0xce   :  { %v1839_v46 = vpop.f32.mrf.mxu0 }
  0xd0   :  { %v1841_v47 = vpop.f32.mrf.mxu0 }
  0xd2   :  { %v1843_v48 = vpop.f32.mrf.mxu0 }
  0xd4   :  { %v1845_v49 = vpop.f32.mrf.mxu0 }
  0xd6   :  { %v1849_v51 = vpop.f32.mrf.mxu0 }
 0x145   :  { %v1749_v18 = vpop.f32.mrf.mxu1 }
 0x146   :  { %v333_v50 = vadd.f32 %v1749_v18, %v1747_v17 }
 0x147   :  { %v327_v20 = vpop.f32.mrf.mxu1 }
 0x148   :  { %v328_v21 = vadd.f32 %v327_v20, %v197_v19  ;;  %v374_v52 = vadd.f32 %v1754_v22, %v333_v50 }
 0x14a   :  { %v373_v23 = vadd.f32 %v1754_v22, %v328_v21 }
 0x14c   :  { %1535 = vtanh.f32 %v373_v23  ;;  %v1335_v25 = vmul.f32 -1.442695, %v373_v23 }
 0x14e   :  { %1537 = vpow2.f32 %v1335_v25 }
 0x159   :  { %v1536_v24 = vpop.eup %1535 }
 0x15a   :  { %393 = vrot.lane.b32.xlu1 %v1536_v24, %s1655_s23 }
 0x15b   :  { %v1538_v26 = vpop.eup %1537 }
 0x15c   :  { %v388_v27 = vadd.f32 1.0, %v1538_v26 }
 0x15e   :  { %1539 = vrcp.f32 %v388_v27 }
 0x16b   :  { %v1540_v28 = vpop.eup %1539 }
 0x1cc   :  { %v394_v29 = vpop.permute.xlu1 %393 }
 0x1cd   :  { %v396_v30 = vmul.f32 %v1540_v28, %v394_v29 }
 0x1cf   :  { %1541 = vtanh.f32 %v396_v30 }
 0x1dc   :  { %v1542_v40 = vpop.eup %1541 }
 0x1dd   :  { %399 = vrot.lane.b32.xlu1 %v1542_v40, %s1656_s3 }
 0x24f   :  { %v400_v42 = vpop.permute.xlu1 %399 }
 0x250   :  { %v1821_v43 = vmul.f32 %v1540_v28, %v400_v42 }
 0x252   :  { %404 = vrot.lane.b32.xlu0 %v1821_v43, %s1658_s1 }
 0x256   :  { %487 = vrot.lane.b32.xlu0 %v396_v30, %s1658_s1 }
 0x2c4   :  { %v405_v44 = vpop.permute.xlu0 %404 }
 0x2c5   :  { %1458 = vmatmul.mubr.msk.f32.vlgmr.msra.gmra.mxu0 %vm236_vm2, %v405_v44 }
 0x2c6   :  { %1472 = vmatpush3.msra.mxu0 %v1761_v31  ;;  %1479 = vmatprep.mubr.msk.f32.mxu0 %vm1657_vm5, %v1654_v10 }
 0x2c7   :  { %1473 = vmatprep.subr.mxu0 %v1654_v10 }
 0x2c8   :  { %1474 = vmatpush3.msra.mxu0 %v1774_v34  ;;  %v488_v2 = vpop.permute.xlu0 %487 }
 0x2c9   :  { %1475 = vmatprep.subr.mxu0 %v1654_v10 }
 0x2ca   :  { %1476 = vmatpush3.msra.mxu0 %v1784_v36 }
 0x2cb   :  { %1477 = vmatprep.subr.mxu0 %v1654_v10 }
 0x2cc   :  { %1478 = vmatpush3.msra.mxu0 %v1800_v39 }
 0x2cd   :  { %1493 = vmatprep.subr.mxu0 %v1654_v10 }
 0x385   :  { %v474_v53 = vpop.f32.mrf.mxu0 }
 0x386   :  { %v478_v54 = vadd.f32 %v474_v53, %v374_v52 }
 0x387   :  { %v1459_v55 = vpop.f32.mrf.mxu0 }
 0x388   :  { %1543 = vtanh.f32 %v478_v54  ;;  %v1337_v57 = vmul.f32 -1.442695, %v478_v54 }
 0x38a   :  { %1545 = vpow2.f32 %v1337_v57 }
 0x395   :  { %v1544_v56 = vpop.eup %1543 }
 0x396   :  { %492 = vrot.lane.b32.xlu1 %v1544_v56, %s1655_s23 }
 0x397   :  { %v1546_v58 = vpop.eup %1545 }
 0x398   :  { %v482_v59 = vadd.f32 1.0, %v1546_v58 }
 0x39a   :  { %1547 = vrcp.f32 %v482_v59 }
 0x3a7   :  { %v1548_v60 = vpop.eup %1547 }
 0x3a8   :  { %v490_v3 = vmul.f32 %v1548_v60, %v488_v2 }
 0x408   :  { %v493_v61 = vpop.permute.xlu1 %492 }
 0x409   :  { %v495_v62 = vmul.f32 %v1548_v60, %v493_v61 }
 0x40b   :  { %497 = vrot.lane.b32.xlu1 %v495_v62, %s1658_s1 }
 0x40f   :  { %48 = vperm.xlu1 %1534, %v33_v63  }
 0x413   :  { %54 = vperm.xlu1 %1534, %v35_v0  }
 0x417   :  { %60 = vperm.xlu1 %1534, %v37_v1  }
 0x47d   :  { %v498_v4 = vpop.permute.xlu1 %497 }
 0x47e   :  { %v1863_v5 = vadd.f32 %v498_v4, %v490_v3 }
 0x480   :  { %1549 = vtanh.f32 %v1863_v5 }
 0x48a   :  { %v49_v6 = vpop.permute.xlu1 %48 }
 0x48b   :  { %vm67_vm6 = vcmp.eq.s32.totalorder %v49_v6, %v1739_v12 }
 0x48c   :  { %v1311_v7 = vsel %vm67_vm6, 1.0, %v1654_v10 }
 0x48d   :  { %v1550_v8 = vpop.eup %1549  ;;  %1440 = vmatprep.mubr.msk.f32.mxu1 %vm236_vm2, %v1311_v7 }
 0x48e   :  { %503 = vrot.lane.b32.xlu0 %v1550_v8, %s1655_s23  ;;  %v55_v17 = vpop.permute.xlu1 %54 }
 0x48f   :  { %vm69_vm7 = vcmp.eq.s32.totalorder %v55_v17, %v1739_v12 }
 0x490   :  { %v1313_v20 = vsel %vm69_vm7, 1.0, %v1654_v10 }
 0x492   :  { %51 = vperm.xlu0 %1533, %v34_v9   ;;  %v61_v18 = vpop.permute.xlu1 %60 }
 0x493   :  { %vm71_vm9 = vcmp.eq.s32.totalorder %v61_v18, %v1739_v12 }
 0x494   :  { %v1315_v24 = vsel %vm71_vm9, 1.0, %v1654_v10 }
 0x496   :  { %57 = vperm.xlu0 %1533, %v36_v13  }
 0x49a   :  { %63 = vperm.xlu0 %1533, %v38_v14  }
 0x500   :  { %v504_v15 = vpop.permute.xlu0 %503 }
 0x501   :  { %v1879_v16 = vmul.f32 %v1548_v60, %v504_v15 }
 0x503   :  { %508 = vrot.lane.b32.xlu1 %v1879_v16, %s1658_s1 }
 0x50d   :  { %v52_v19 = vpop.permute.xlu0 %51 }
 0x50e   :  { %vm68_vm8 = vcmp.eq.s32.totalorder %v52_v19, %v1739_v12 }
 0x50f   :  { %v1312_v21 = vsel %vm68_vm8, 1.0, %v1654_v10 }
 0x510   :  { %1441 = vmatmul.mubr.msk.f32.gmra.mxu1 %vm236_vm2, %v1312_v21 }
 0x511   :  { %v58_v23 = vpop.permute.xlu0 %57  ;;  %1443 = vmatprep.mubr.msk.f32.mxu1 %vm236_vm2, %v1313_v20 }
 0x512   :  { %vm70_vm10 = vcmp.eq.s32.totalorder %v58_v23, %v1739_v12 }
 0x513   :  { %v1314_v25 = vsel %vm70_vm10, 1.0, %v1654_v10 }
 0x514   :  { %1444 = vmatmul.mubr.msk.f32.gmra.mxu1 %vm236_vm2, %v1314_v25 }
 0x515   :  { %v64_v26 = vpop.permute.xlu0 %63  ;;  %1446 = vmatprep.mubr.msk.f32.mxu1 %vm236_vm2, %v1315_v24 }
 0x516   :  { %vm72_vm11 = vcmp.eq.s32.totalorder %v64_v26, %v1739_v12 }
 0x517   :  { %v1316_v27 = vsel %vm72_vm11, 1.0, %v1654_v10 }
 0x518   :  { %1447 = vmatmul.mubr.msk.f32.gmra.mxu1 %vm236_vm2, %v1316_v27 }
 0x519   :  { %1468 = vmatprep.mubr.msk.f32.mxu1 %vm1657_vm5, %v1654_v10 }
 0x575   :  { %v509_v28 = vpop.permute.xlu1 %508 }
 0x576   :  { %1469 = vmatmul.mubr.msk.f32.vlgmr.msra.gmra.mxu1 %vm236_vm2, %v509_v28 }
 0x577   :  { %1483 = vmatpush3.msra.mxu1 %v1761_v31  ;;  %1490 = vmatprep.mubr.msk.f32.mxu1 %vm1657_vm5, %v1654_v10 }
 0x578   :  { %1484 = vmatprep.subr.mxu1 %v1654_v10 }
 0x579   :  { %1485 = vmatpush3.msra.mxu1 %v1774_v34 }
 0x57a   :  { %1486 = vmatprep.subr.mxu1 %v1654_v10 }
 0x57b   :  { %1487 = vmatpush3.msra.mxu1 %v1784_v36 }
 0x57c   :  { %1488 = vmatprep.subr.mxu1 %v1654_v10 }
 0x57d   :  { %1489 = vmatpush3.msra.mxu1 %v1800_v39 }
 0x57e   :  { %1504 = vmatprep.subr.mxu1 %v1654_v10 }
 0x5d0   :  { %v1442_v29 = vpop.f32.mrf.mxu1 }
 0x5d1   :  { %v343_v0 = vadd.f32 %v1442_v29, %v1837_v45 }
 0x5d2   :  { %v337_v30 = vpop.f32.mrf.mxu1 }
 0x5d3   :  { %v338_v37 = vadd.f32 %v337_v30, %v1839_v46  ;;  %v376_v1 = vadd.f32 %v1754_v22, %v343_v0 }
 0x5d4   :  { %v1911_v32 = vpop.f32.mrf.mxu1 }
 0x5d5   :  { %v375_v40 = vadd.f32 %v1754_v22, %v338_v37 }
 0x5d6   :  { %v1913_v33 = vpop.f32.mrf.mxu1 }
 0x5d7   :  { %v348_v23 = vadd.f32 %v1913_v33, %v1843_v48 }
 0x5d8   :  { %v1915_v35 = vpop.f32.mrf.mxu1 }
 0x5d9   :  { %v377_v24 = vadd.f32 %v1754_v22, %v348_v23 }
 0x5da   :  { %v1918_v38 = vpop.f32.mrf.mxu1 }
 0x636   :  { %v578_v41 = vpop.f32.mrf.mxu1 }
 0x637   :  { %v582_v42 = vadd.f32 %v578_v41, %v375_v40 }
 0x638   :  { %v1470_v44 = vpop.f32.mrf.mxu1 }
 0x639   :  { %1551 = vtanh.f32 %v582_v42  ;;  %v1339_v52 = vmul.f32 -1.442695, %v582_v42 }
 0x63b   :  { %1553 = vpow2.f32 %v1339_v52 }
 0x646   :  { %v1552_v50 = vpop.eup %1551 }
 0x647   :  { %592 = vrot.lane.b32.xlu0 %v1552_v50, %s1655_s23 }
 0x648   :  { %v1554_v53 = vpop.eup %1553 }
 0x649   :  { %v586_v54 = vadd.f32 1.0, %v1554_v53 }
 0x64b   :  { %1555 = vrcp.f32 %v586_v54 }
 0x658   :  { %v1556_v55 = vpop.eup %1555 }
 0x659   :  { %v590_v46 = vmul.f32 %v1556_v55, %v1863_v5 }
 0x6b9   :  { %v593_v56 = vpop.permute.xlu0 %592 }
 0x6ba   :  { %v595_v57 = vmul.f32 %v1556_v55, %v593_v56 }
 0x6bc   :  { %597 = vrot.lane.b32.xlu1 %v595_v57, %s1658_s1 }
 0x72e   :  { %v598_v58 = vpop.permute.xlu1 %597 }
 0x72f   :  { %v600_v59 = vadd.f32 %v598_v58, %v590_v46 }
 0x731   :  { %1557 = vtanh.f32 %v600_v59 }
 0x73e   :  { %v1558_v60 = vpop.eup %1557 }
 0x73f   :  { %603 = vrot.lane.b32.xlu0 %v1558_v60, %s1655_s23 }
 0x7b1   :  { %v604_v61 = vpop.permute.xlu0 %603 }
 0x7b2   :  { %v1925_v62 = vmul.f32 %v1556_v55, %v604_v61  ;;  %v353_v55 = vadd.f32 %v1911_v32, %v1841_v47 }
 0x7b4   :  { %608 = vrot.lane.b32.xlu1 %v1925_v62, %s1658_s1 }
 0x826   :  { %v609_v63 = vpop.permute.xlu1 %608 }
 0x827   :  { %1480 = vmatmul.mubr.msk.f32.vlgmr.msra.gmra.mxu0 %vm236_vm2, %v609_v63 }
 0x828   :  { %1494 = vmatpush3.msra.mxu0 %v1761_v31  ;;  %1501 = vmatprep.mubr.msk.f32.mxu0 %vm1657_vm5, %v1654_v10 }
 0x829   :  { %1495 = vmatprep.subr.mxu0 %v1654_v10 }
 0x82a   :  { %1496 = vmatpush3.msra.mxu0 %v1774_v34 }
 0x82b   :  { %1497 = vmatprep.subr.mxu0 %v1654_v10 }
 0x82c   :  { %1498 = vmatpush3.msra.mxu0 %v1784_v36 }
 0x82d   :  { %1499 = vmatprep.subr.mxu0 %v1654_v10 }
 0x82e   :  { %1500 = vmatpush3.msra.mxu0 %v1800_v39 }
 0x82f   :  { %1515 = vmatprep.subr.mxu0 %v1654_v10 }
 0x8e7   :  { %v678_v2 = vpop.f32.mrf.mxu0 }
 0x8e8   :  { %v682_v3 = vadd.f32 %v678_v2, %v376_v1 }
 0x8e9   :  { %v1481_v4 = vpop.f32.mrf.mxu0 }
 0x8ea   :  { %1559 = vtanh.f32 %v682_v3  ;;  %v1341_v6 = vmul.f32 -1.442695, %v682_v3  ;;  %v358_v3 = vadd.f32 %v1918_v38, %v1849_v51 }
 0x8ec   :  { %1561 = vpow2.f32 %v1341_v6  ;;  %v379_v4 = vadd.f32 %v1754_v22, %v358_v3 }
 0x8f7   :  { %v1560_v5 = vpop.eup %1559 }
 0x8f8   :  { %692 = vrot.lane.b32.xlu0 %v1560_v5, %s1655_s23 }
 0x8f9   :  { %v1562_v7 = vpop.eup %1561 }
 0x8fa   :  { %v686_v8 = vadd.f32 1.0, %v1562_v7 }
 0x8fc   :  { %1563 = vrcp.f32 %v686_v8 }
 0x909   :  { %v1564_v9 = vpop.eup %1563 }
 0x90a   :  { %v690_v45 = vmul.f32 %v1564_v9, %v600_v59 }
 0x96a   :  { %v693_v13 = vpop.permute.xlu0 %692 }
 0x96b   :  { %v695_v14 = vmul.f32 %v1564_v9, %v693_v13 }
 0x96d   :  { %697 = vrot.lane.b32.xlu1 %v695_v14, %s1658_s1 }
 0x9df   :  { %v698_v15 = vpop.permute.xlu1 %697 }
 0x9e0   :  { %v700_v17 = vadd.f32 %v698_v15, %v690_v45 }
 0x9e2   :  { %1565 = vtanh.f32 %v700_v17 }
 0x9ef   :  { %v1566_v18 = vpop.eup %1565 }
 0x9f0   :  { %703 = vrot.lane.b32.xlu0 %v1566_v18, %s1655_s23 }
 0xa62   :  { %v704_v19 = vpop.permute.xlu0 %703 }
 0xa63   :  { %v1945_v20 = vmul.f32 %v1564_v9, %v704_v19 }
 0xa65   :  { %708 = vrot.lane.b32.xlu1 %v1945_v20, %s1658_s1 }
 0xad7   :  { %v709_v21 = vpop.permute.xlu1 %708 }
 0xad8   :  { %1491 = vmatmul.mubr.msk.f32.vlgmr.msra.gmra.mxu1 %vm236_vm2, %v709_v21 }
 0xad9   :  { %1505 = vmatpush3.msra.mxu1 %v1761_v31  ;;  %1512 = vmatprep.mubr.msk.f32.mxu1 %vm1657_vm5, %v1654_v10 }
 0xada   :  { %1506 = vmatprep.subr.mxu1 %v1654_v10 }
 0xadb   :  { %1507 = vmatpush3.msra.mxu1 %v1774_v34 }
 0xadc   :  { %1508 = vmatprep.subr.mxu1 %v1654_v10 }
 0xadd   :  { %1509 = vmatpush3.msra.mxu1 %v1784_v36 }
 0xade   :  { %1510 = vmatprep.subr.mxu1 %v1654_v10 }
 0xadf   :  { %1511 = vmatpush3.msra.mxu1 %v1800_v39 }
 0xb98   :  { %v778_v25 = vpop.f32.mrf.mxu1 }
 0xb99   :  { %v782_v26 = vadd.f32 %v778_v25, %v377_v24  ;;  %v363_v25 = vadd.f32 %v1915_v35, %v1845_v49 }
 0xb9a   :  { %v1492_v27 = vpop.f32.mrf.mxu1 }
 0xb9b   :  { %1567 = vtanh.f32 %v782_v26  ;;  %v1343_v29 = vmul.f32 -1.442695, %v782_v26  ;;  %v380_v26 = vadd.f32 %v1754_v22, %v363_v25 }
 0xb9d   :  { %1569 = vpow2.f32 %v1343_v29 }
 0xba8   :  { %v1568_v28 = vpop.eup %1567 }
 0xba9   :  { %792 = vrot.lane.b32.xlu0 %v1568_v28, %s1655_s23 }
 0xbaa   :  { %v1570_v30 = vpop.eup %1569 }
 0xbab   :  { %v786_v37 = vadd.f32 1.0, %v1570_v30 }
 0xbad   :  { %1571 = vrcp.f32 %v786_v37  ;;  %v1350_v37 = vld [vmem:[%s2044_s6] ss:$0 sm:$0xff] }
 0xbba   :  { %v1572_v40 = vpop.eup %1571 }
 0xbbb   :  { %v790_v48 = vmul.f32 %v1572_v40, %v700_v17 }
 0xc1b   :  { %v793_v41 = vpop.permute.xlu0 %792 }
 0xc1c   :  { %v795_v42 = vmul.f32 %v1572_v40, %v793_v41 }
 0xc1e   :  { %797 = vrot.lane.b32.xlu1 %v795_v42, %s1658_s1 }
 0xc90   :  { %v798_v33 = vpop.permute.xlu1 %797 }
 0xc91   :  { %v800_v44 = vadd.f32 %v798_v33, %v790_v48 }
 0xc93   :  { %1573 = vtanh.f32 %v800_v44 }
 0xca0   :  { %v1574_v50 = vpop.eup %1573 }
 0xca1   :  { %803 = vrot.lane.b32.xlu0 %v1574_v50, %s1655_s23 }
 0xd13   :  { %v804_v52 = vpop.permute.xlu0 %803 }
 0xd14   :  { %v1965_v53 = vmul.f32 %v1572_v40, %v804_v52 }
 0xd16   :  { %808 = vrot.lane.b32.xlu1 %v1965_v53, %s1658_s1 }
 0xd88   :  { %v809_v54 = vpop.permute.xlu1 %808 }
 0xd89   :  { %1502 = vmatmul.mubr.msk.f32.vlgmr.msra.gmra.mxu0 %vm236_vm2, %v809_v54 }
 0xd8a   :  { %1516 = vmatpush3.msra.mxu0 %v1761_v31  ;;  %1523 = vmatprep.mubr.msk.f32.mxu0 %vm1657_vm5, %v1654_v10  ;;  %v378_v31 = vadd.f32 %v1754_v22, %v353_v55 }
 0xd8b   :  { %1517 = vmatprep.subr.mxu0 %v1654_v10 }
 0xd8c   :  { %1518 = vmatpush3.msra.mxu0 %v1774_v34 }
 0xd8d   :  { %1519 = vmatprep.subr.mxu0 %v1654_v10 }
 0xd8e   :  { %1520 = vmatpush3.msra.mxu0 %v1784_v36 }
 0xd8f   :  { %1521 = vmatprep.subr.mxu0 %v1654_v10 }
 0xd90   :  { %1522 = vmatpush3.msra.mxu0 %v1800_v39 }
 0xe49   :  { %v878_v56 = vpop.f32.mrf.mxu0 }
 0xe4a   :  { %v882_v57 = vadd.f32 %v878_v56, %v378_v31 }
 0xe4b   :  { %v1503_v46 = vpop.f32.mrf.mxu0 }
 0xe4c   :  { %1575 = vtanh.f32 %v882_v57  ;;  %v1345_v34 = vmul.f32 -1.442695, %v882_v57 }
 0xe4e   :  { %1577 = vpow2.f32 %v1345_v34 }
 0xe59   :  { %v1576_v58 = vpop.eup %1575 }
 0xe5a   :  { %892 = vrot.lane.b32.xlu0 %v1576_v58, %s1655_s23 }
 0xe5b   :  { %v1578_v59 = vpop.eup %1577 }
 0xe5c   :  { %v886_v36 = vadd.f32 1.0, %v1578_v59 }
 0xe5e   :  { %1579 = vrcp.f32 %v886_v36 }
 0xe6b   :  { %v1580_v10 = vpop.eup %1579 }
 0xe6c   :  { %v890_v47 = vmul.f32 %v1580_v10, %v800_v44 }
 0xecc   :  { %v893_v60 = vpop.permute.xlu0 %892 }
 0xecd   :  { %v895_v39 = vmul.f32 %v1580_v10, %v893_v60 }
 0xecf   :  { %897 = vrot.lane.b32.xlu1 %v895_v39, %s1658_s1 }
 0xf41   :  { %v898_v32 = vpop.permute.xlu1 %897 }
 0xf42   :  { %v900_v61 = vadd.f32 %v898_v32, %v890_v47 }
 0xf44   :  { %1581 = vtanh.f32 %v900_v61 }
 0xf51   :  { %v1582_v63 = vpop.eup %1581 }
 0xf52   :  { %903 = vrot.lane.b32.xlu0 %v1582_v63, %s1655_s23 }
 0xfc4   :  { %v904_v0 = vpop.permute.xlu0 %903 }
 0xfc5   :  { %v1985_v1 = vmul.f32 %v1580_v10, %v904_v0 }
 0xfc7   :  { %908 = vrot.lane.b32.xlu1 %v1985_v1, %s1658_s1 }
0x1039   :  { %v909_v2 = vpop.permute.xlu1 %908 }
0x103a   :  { %1513 = vmatmul.mubr.msk.f32.vlgmr.msra.gmra.mxu1 %vm236_vm2, %v909_v2 }
0x10fa   :  { %v978_v5 = vpop.f32.mrf.mxu1 }
0x10fb   :  { %v982_v6 = vadd.f32 %v978_v5, %v379_v4 }
0x10fc   :  { %v1514_v7 = vpop.f32.mrf.mxu1 }
0x10fd   :  { %1583 = vtanh.f32 %v982_v6  ;;  %v1347_v9 = vmul.f32 -1.442695, %v982_v6  ;;  %v1181_v6 = vstv %s2045_s7  ;;  %s1659_s7 = smov [#allocation3]  }
0x10fe   :  { %s1301_s10 = sshll.u32 %s1659_s7, 4  ;;  %s1302_s10 = int_to_ptr.vmem [resolvable:$true] %s1301_s10 }
0x10ff   :  { %1585 = vpow2.f32 %v1347_v9  ;;  %s1631_s11 = scalar_lea.vmem %s1302_s10, 128  ;;  %p1636_p1 = scmp.lt.s32.totalorder %s1302_s10, %s1302_s10 }
0x1100   :  { %p1632_p0 = scmp.ne.s32.totalorder %s1302_s10, %s1631_s11  ;;  %p1637_p2 = scmp.lt.s32.totalorder %s1631_s11, %s1631_s11 }
0x1102   :  { %p1638_p3 = por %p1637_p2, %p1636_p1 }
0x1104   :  { %p1639_p4 = pnand %p1638_p3, %p1632_p0 }
0x110a   :  { %v1584_v8 = vpop.eup %1583 }
0x110b   :  { %992 = vrot.lane.b32.xlu0 %v1584_v8, %s1655_s23 }
0x110c   :  { %v1586_v13 = vpop.eup %1585 }
0x110d   :  { %v986_v14 = vadd.f32 1.0, %v1586_v13 }
0x110f   :  { %1587 = vrcp.f32 %v986_v14 }
0x111c   :  { %v1588_v45 = vpop.eup %1587 }
0x111d   :  { %v990_v51 = vmul.f32 %v1588_v45, %v900_v61 }
0x117d   :  { %v993_v15 = vpop.permute.xlu0 %992 }
0x117e   :  { %v995_v17 = vmul.f32 %v1588_v45, %v993_v15 }
0x1180   :  { %997 = vrot.lane.b32.xlu1 %v995_v17, %s1658_s1 }
0x11f2   :  { %v998_v38 = vpop.permute.xlu1 %997 }
0x11f3   :  { %v1000_v18 = vadd.f32 %v998_v38, %v990_v51 }
0x11f5   :  { %1589 = vtanh.f32 %v1000_v18 }
0x1202   :  { %v1590_v19 = vpop.eup %1589 }
0x1203   :  { %1003 = vrot.lane.b32.xlu0 %v1590_v19, %s1655_s23 }
0x1275   :  { %v1004_v21 = vpop.permute.xlu0 %1003 }
0x1276   :  { %v1006_v23 = vmul.f32 %v1588_v45, %v1004_v21 }
0x1278   :  { %1008 = vrot.lane.b32.xlu1 %v1006_v23, %s1658_s1 }
0x12ea   :  { %v1009_v24 = vpop.permute.xlu1 %1008 }
0x12eb   :  { %1524 = vmatmul.mubr.msk.f32.vlgmr.msra.gmra.mxu0 %vm236_vm2, %v1009_v24 }
0x13ab   :  { %v1078_v27 = vpop.f32.mrf.mxu0 }
0x13ac   :  { %v1082_v28 = vadd.f32 %v1078_v27, %v380_v26 }
0x13ad   :  { %v1525_v29 = vpop.f32.mrf.mxu0 }
0x13ae   :  { %1591 = vtanh.f32 %v1082_v28  ;;  %v1349_v40 = vmul.f32 -1.442695, %v1082_v28 }
0x13b0   :  { %1593 = vpow2.f32 %v1349_v40 }
0x13bb   :  { %v1592_v30 = vpop.eup %1591 }
0x13bc   :  { %1092 = vrot.lane.b32.xlu0 %v1592_v30, %s1655_s23 }
0x13bd   :  { %v1594_v41 = vpop.eup %1593 }
0x13be   :  { %v1086_v42 = vadd.f32 1.0, %v1594_v41 }
0x13c0   :  { %1113 = vrot.lane.b32.xlu0 %v1350_v37, %s1656_s3  ;;  %1595 = vrcp.f32 %v1086_v42 }
0x13cd   :  { %v1596_v49 = vpop.eup %1595 }
0x13ce   :  { %v1090_v54 = vmul.f32 %v1596_v49, %v1000_v18 }
0x142e   :  { %v1093_v22 = vpop.permute.xlu0 %1092 }
0x142f   :  { %v1095_v35 = vmul.f32 %v1596_v49, %v1093_v22 }
0x1431   :  { %1097 = vrot.lane.b32.xlu1 %v1095_v35, %s1658_s1 }
0x1432   :  { %v1114_v48 = vpop.permute.xlu0 %1113 }
0x1433   :  { %v1116_v33 = vmul.f32 %v1114_v48, %v1821_v43  ;;  %v1118_v44 = vmul.f32 %v1114_v48, %v1925_v62  ;;  %v1120_v50 = vmul.f32 %v1114_v48, %v1965_v53  ;;  %v1122_v52 = vmul.f32 %v1114_v48, %v1006_v23 }
0x1434   :  { %v1117_v53 = vmul.f32 %v1114_v48, %v1879_v16  ;;  %v1119_v58 = vmul.f32 %v1114_v48, %v1945_v20  ;;  %v1121_v34 = vmul.f32 %v1114_v48, %v1985_v1 }
0x1435   :  { %1132 = vrot.lane.b32.xlu0 %v1116_v33, %s1658_s1 }
0x1439   :  { %1136 = vrot.lane.b32.xlu0 %v1118_v44, %s1658_s1 }
0x143d   :  { %1140 = vrot.lane.b32.xlu0 %v1120_v50, %s1658_s1 }
0x1441   :  { %1144 = vrot.lane.b32.xlu0 %v1122_v52, %s1658_s1 }
0x14a3   :  { %v1098_v55 = vpop.permute.xlu1 %1097 }
0x14a4   :  { %v1100_v31 = vadd.f32 %v1098_v55, %v1090_v54 }
0x14a6   :  { %1597 = vtanh.f32 %v1100_v31  ;;  %v1247_v31 = vshrl.u32 %v39_v11, 7 }
0x14a7   :  { %v1133_v56 = vpop.permute.xlu0 %1132 }
0x14a8   :  { %v1156_v43 = vsel %vm236_vm2, %v1133_v56, 0.0 }
0x14a9   :  { %1157 = vadd.xlane.f32.xlu0 %v1156_v43 }
0x14ab   :  { %v1137_v57 = vpop.permute.xlu0 %1136 }
0x14ac   :  { %v1162_v62 = vsel %vm236_vm2, %v1137_v57, 0.0 }
0x14ad   :  { %1163 = vadd.xlane.f32.xlu0 %v1162_v62  ;;  %v1248_v62 = vsub.s32 %v1739_v12, %v1247_v31 }
0x14af   :  { %v1141_v20 = vpop.permute.xlu0 %1140 }
0x14b0   :  { %v1168_v63 = vsel %vm236_vm2, %v1141_v20, 0.0 }
0x14b3   :  { %v1598_v46 = vpop.eup %1597  ;;  %v1145_v0 = vpop.permute.xlu0 %1144 }
0x14b4   :  { %1103 = vrot.lane.b32.xlu1 %v1598_v46, %s1655_s23  ;;  %v1174_v1 = vsel %vm236_vm2, %v1145_v0, 0.0 }
0x14b8   :  { %1134 = vrot.lane.b32.xlu1 %v1117_v53, %s1658_s1 }
0x14bc   :  { %1138 = vrot.lane.b32.xlu1 %v1119_v58, %s1658_s1 }
0x14c0   :  { %1142 = vrot.lane.b32.xlu1 %v1121_v34, %s1658_s1 }
0x1526   :  { %v1104_v59 = vpop.permute.xlu1 %1103 }
0x1527   :  { %v1106_v36 = vmul.f32 %v1596_v49, %v1104_v59 }
0x1529   :  { %v1123_v10 = vmul.f32 %v1114_v48, %v1106_v36 }
0x152a   :  { %v1135_v60 = vpop.permute.xlu1 %1134 }
0x152b   :  { %1146 = vrot.lane.b32.xlu1 %v1123_v10, %s1658_s1  ;;  %v1159_v61 = vsel %vm236_vm2, %v1135_v60, 0.0 }
0x152e   :  { %v1139_v39 = vpop.permute.xlu1 %1138 }
0x152f   :  { %v1165_v47 = vsel %vm236_vm2, %v1139_v39, 0.0 }
0x1530   :  { %1166 = vadd.xlane.f32.xlu0 %v1165_v47 }
0x1532   :  { %v1143_v16 = vpop.permute.xlu1 %1142  ;;  %v1158_v4 = vpop.xlane.xlu0 %1157 }
0x1533   :  { %v1171_v32 = vsel %vm236_vm2, %v1143_v16, 0.0  ;;  %v1182_v8 = vadd.f32 %v1181_v6, %v1158_v4 }
0x1534   :  { %1172 = vadd.xlane.f32.xlu0 %v1171_v32 }
0x1535   :  { %v1351_v45 = vmul.f32 -1.442695, %v1182_v8 }
0x1536   :  { %v1164_v9 = vpop.xlane.xlu0 %1163 }
0x1537   :  { %v1184_v15 = vadd.f32 %v1181_v6, %v1164_v9 }
0x1539   :  { %v1353_v38 = vmul.f32 -1.442695, %v1184_v15 }
0x154f   :  { %1160 = vadd.xlane.f32.xlu1 %v1159_v61 }
0x1553   :  { %1169 = vadd.xlane.f32.xlu1 %v1168_v63 }
0x1557   :  { %1175 = vadd.xlane.f32.xlu1 %v1174_v1 }
0x159d   :  { %v1147_v2 = vpop.permute.xlu1 %1146 }
0x159e   :  { %v1177_v3 = vsel %vm236_vm2, %v1147_v2, 0.0  ;;  %vm1290_vm2 = vcmask 1047559  }
0x159f   :  { %1178 = vadd.xlane.f32.xlu0 %v1177_v3 }
0x15b9   :  { %v1167_v17 = vpop.xlane.xlu0 %1166 }
0x15ba   :  { %v1185_v51 = vadd.f32 %v1181_v6, %v1167_v17 }
0x15bc   :  { %v1354_v23 = vmul.f32 -1.442695, %v1185_v51 }
0x15bd   :  { %v1173_v21 = vpop.xlane.xlu0 %1172 }
0x15be   :  { %v1187_v26 = vadd.f32 %v1181_v6, %v1173_v21 }
0x15c0   :  { %v1356_v28 = vmul.f32 -1.442695, %v1187_v26 }
0x15d8   :  { %v1161_v5 = vpop.xlane.xlu1 %1160 }
0x15d9   :  { %v1183_v7 = vadd.f32 %v1181_v6, %v1161_v5 }
0x15db   :  { %v1352_v13 = vmul.f32 -1.442695, %v1183_v7 }
0x15dc   :  { %v1170_v14 = vpop.xlane.xlu1 %1169 }
0x15dd   :  { %1599 = vpow2.f32 %v1352_v13  ;;  %v1186_v18 = vadd.f32 %v1181_v6, %v1170_v14 }
0x15de   :  { %1601 = vpow2.f32 %v1351_v45 }
0x15df   :  { %1603 = vpow2.f32 %v1353_v38  ;;  %v1355_v24 = vmul.f32 -1.442695, %v1186_v18 }
0x15e0   :  { %v1176_v19 = vpop.xlane.xlu1 %1175  ;;  %1605 = vpow2.f32 %v1354_v23 }
0x15e1   :  { %v1188_v25 = vadd.f32 %v1181_v6, %v1176_v19  ;;  %1607 = vpow2.f32 %v1355_v24 }
0x15e3   :  { %v1357_v27 = vmul.f32 -1.442695, %v1188_v25 }
0x15e5   :  { %1609 = vpow2.f32 %v1357_v27 }
0x15e6   :  { %1611 = vpow2.f32 %v1356_v28 }
0x15ea   :  { %v1600_v29 = vpop.eup %1599 }
0x15eb   :  { %v1602_v30 = vpop.eup %1601  ;;  %v1215_v37 = vadd.f32 1.0, %v1600_v29 }
0x15ec   :  { %v1214_v40 = vadd.f32 1.0, %v1602_v30  ;;  %v1604_v42 = vpop.eup %1603 }
0x15ed   :  { %1613 = vrcp.f32 %v1215_v37  ;;  %v1606_v35 = vpop.eup %1605  ;;  %v1216_v48 = vadd.f32 1.0, %v1604_v42 }
0x15ee   :  { %1615 = vrcp.f32 %v1214_v40  ;;  %v1608_v33 = vpop.eup %1607  ;;  %v1217_v44 = vadd.f32 1.0, %v1606_v35 }
0x15ef   :  { %v1218_v50 = vadd.f32 1.0, %v1608_v33 }
0x15f2   :  { %v1610_v52 = vpop.eup %1609 }
0x15f3   :  { %v1612_v54 = vpop.eup %1611  ;;  %v1220_v55 = vadd.f32 1.0, %v1610_v52 }
0x15f4   :  { %v1219_v56 = vadd.f32 1.0, %v1612_v54 }
0x15fa   :  { %v1614_v43 = vpop.eup %1613 }
0x15fb   :  { %v1616_v57 = vpop.eup %1615  ;;  %v1253_v53 = vrot.slane %v1614_v43, %v1248_v62 }
0x15fc   :  { %v1249_v59 = vrot.slane %v1616_v57, %v1248_v62 }
0x15fe   :  { %v1279_v36 = vsel %vm1278_vm12, %v1253_v53, %v1249_v59 }
0x1628   :  { %v1179_v41 = vpop.xlane.xlu0 %1178 }
0x1629   :  { %v1189_v49 = vadd.f32 %v1181_v6, %v1179_v41 }
0x162b   :  { %v1358_v22 = vmul.f32 -1.442695, %v1189_v49 }
0x162d   :  { %1617 = vpow2.f32 %v1358_v22 }
0x162e   :  { %1619 = vrcp.f32 %v1216_v48 }
0x162f   :  { %1621 = vrcp.f32 %v1217_v44 }
0x1630   :  { %1623 = vrcp.f32 %v1218_v50 }
0x1631   :  { %1625 = vrcp.f32 %v1220_v55 }
0x1632   :  { %1627 = vrcp.f32 %v1219_v56 }
0x163a   :  { %v1618_v46 = vpop.eup %1617 }
0x163b   :  { %v1221_v58 = vadd.f32 1.0, %v1618_v46  ;;  %v1620_v34 = vpop.eup %1619 }
0x163c   :  { %v1622_v10 = vpop.eup %1621  ;;  %v1257_v60 = vrot.slane %v1620_v34, %v1248_v62 }
0x163d   :  { %1629 = vrcp.f32 %v1221_v58  ;;  %v1624_v39 = vpop.eup %1623  ;;  %v1261_v47 = vrot.slane %v1622_v10, %v1248_v62 }
0x163e   :  { %v1281_v11 = vsel %vm1280_vm13, %v1257_v60, %v1279_v36  ;;  %v1265_v16 = vrot.slane %v1624_v39, %v1248_v62  ;;  %v1626_v32 = vpop.eup %1625 }
0x163f   :  { %v1283_v20 = vsel %vm1282_vm14, %v1261_v47, %v1281_v11  ;;  %v1628_v12 = vpop.eup %1627  ;;  %v1273_v61 = vrot.slane %v1626_v32, %v1248_v62 }
0x1640   :  { %v1285_v63 = vsel %vm1284_vm15, %v1265_v16, %v1283_v20  ;;  %v1269_v0 = vrot.slane %v1628_v12, %v1248_v62 }
0x1642   :  { %v1287_v3 = vsel %vm1286_vm0, %v1269_v0, %v1285_v63 }
0x1643   :  { %v1289_v4 = vsel %vm1288_vm1, %v1273_v61, %v1287_v3 }
0x164a   :  { %v1630_v1 = vpop.eup %1629 }
0x164b   :  { %v1277_v2 = vrot.slane %v1630_v1, %v1248_v62 }
0x164d   :  { %v1291_v5 = vsel %vm1290_vm2, %v1277_v2, %v1289_v4 }
0x164e   :  { %1294 = vst.msk [vmem:[#allocation3] sm:$0xff] %vm1293_vm3, %v1291_v5 }
0x164f   :  { %1642 = shalt.err (!%p1639_p4)
}
0x1650   :  { %1304 = dma.vmem_to_hbm [thread:$0]  %s1302_s10, 128, %s2046_s8, [#allocation4]  }
0x1651   :  { %1651 = dma.done.wait [#allocation4], 128  }
0x1652   :  { %1652 = vsyncadd [#allocation4], 4294967168 }
0x1653   :  { %1308 = vsyncpa [#allocation4], 1 }

</bundles_post_ra>
